<compile_context>
chip_gen: v6e
topology: v6e:2x2x1
jax: 0.10.0
libtpu: 0.0.40
codegen_flags: <defaults>
</compile_context>

<pallas_src>
import functools

import jax
import jax.numpy as jnp
from jax.experimental import pallas as pl
from jax.experimental.pallas import tpu as pltpu


def _axial_dw_kernel(x_ref, taps_ref, ctr_ref, dwb_ref, cw_ref, cb_ref, out_ref,
                     *, shifts, C, Cout, Gb, use_mxu):
    x = x_ref[...]                      # (Bt, GC, HW) f32, spatial on the lane axis
    ctr = ctr_ref[...]                  # (1, GC)  = hw[:,P] + vw[:,P] + 1 (tiled Gb)
    dwb = dwb_ref[...]                  # (1, GC)  = hb + vb (tiled Gb)

    # Depthwise taps. Two accumulators expose ILP to the 4 VALUs; rolls run on
    # the XLU so they overlap the multiplies. Masks are pre-folded into taps.
    acc0 = ctr[:, :, None] * x          # centre taps + residual folded together
    acc1 = None
    for j, shift in enumerate(shifts):
        xr = pltpu.roll(x, shift, axis=2)               # static lane rotation
        contrib = taps_ref[j][None, :, :] * xr          # 1 vmul (+1 vadd below)
        if j % 2 == 0:
            acc0 = acc0 + contrib
        else:
            acc1 = contrib if acc1 is None else acc1 + contrib
    if acc1 is not None:
        acc0 = acc0 + acc1
    r = jnp.maximum(acc0 + dwb[:, :, None], 0.0)        # (Bt, GC, HW) ReLU

    # 1x1 projection, per packed batch element (each group of C sublanes).
    cw = cw_ref[...]                    # (Cout, C)
    cb = cb_ref[...]                    # (1, Cout)
    for g in range(Gb):
        rg = r[:, g * C:(g + 1) * C, :]                 # (Bt, C, HW)
        if use_mxu:
            og = jnp.einsum('oc,bcs->bos', cw, rg,
                            preferred_element_type=jnp.float32) + cb[:, :, None]
        else:
            # tiny C: unrolled VPU reduction (MXU would be <4% utilised)
            og0 = cb[:, :, None]
            og1 = None
            for c in range(C):
                t = cw[None, :, c:c + 1] * rg[:, c:c + 1, :]
                if c % 2 == 0:
                    og0 = og0 + t
                else:
                    og1 = t if og1 is None else og1 + t
            og = og0 if og1 is None else og0 + og1
        out_ref[:, g * Cout:(g + 1) * Cout, :] = og.astype(out_ref.dtype)


def _tpu_budget():
    """(vmem_capacity_bytes, num_tensorcores) with conservative fallbacks."""
    vmem_cap = 64 << 20                 # v7x floor -> safe on every generation
    n_cores = 1
    try:
        info = pltpu.get_tpu_info()
        vmem_cap = int(getattr(info, "vmem_capacity_bytes", vmem_cap) or vmem_cap)
        for name in ("num_tensorcores", "num_cores", "core_count", "tensorcore_count"):
            v = getattr(info, name, None)
            if v:
                n_cores = int(v)
                break
    except Exception:
        pass
    return vmem_cap, n_cores


def _pick_group(B, C, sublanes=8):
    """Smallest Gb dividing B such that Gb*C fills the f32 sublane axis."""
    for g in range(1, B + 1):
        if B % g == 0 and (g * C) % sublanes == 0:
            return g
    return 1


def _pick_batch_tile(n_groups, per_group_bytes, fixed_bytes, budget_bytes, min_steps):
    """Largest divisor of n_groups whose double-buffered footprint fits the budget."""
    min_steps = max(1, min(min_steps, n_groups))
    best = 1
    for t in range(1, n_groups + 1):
        if n_groups % t:
            continue
        if n_groups // t < min_steps:
            continue
        if 2 * t * per_group_bytes + fixed_bytes <= budget_bytes:
            best = t
    return best


def axial_depthwise_conv(x, hw, hb, vw, vb, cw, cb, *, kernel_length=5):
    """x: (B, C, H, W) float32. Returns (B, Cout, H, W) float32."""
    B, C, H, W = x.shape
    Cout = cw.shape[0]
    K = kernel_length
    assert K % 2 == 1, "kernel_length must be odd (matches PyTorch 'same' padding)"
    P = K // 2
    HW = H * W

    # Pack Gb consecutive batch elements into the channel (sublane) axis so f32
    # vregs are full even for tiny C. Metadata-only reshape for contiguous NCHW.
    Gb = _pick_group(B, C)
    GC = Gb * C
    n_groups = B // Gb
    xf = x.reshape(n_groups, GC, HW).astype(jnp.float32)

    hw_f = hw.astype(jnp.float32)       # (C, K) horizontal taps
    vw_f = vw.astype(jnp.float32)       # (C, K) vertical taps

    # Mask-folded off-centre taps: plane[j][c, s] = weight[c] * validity(flat pos s).
    w_idx = jnp.arange(W)
    h_idx = jnp.arange(H)
    planes, shifts = [], []
    for d in range(-P, P + 1):
        if d == 0:
            continue
        # horizontal tap: out[., h, w] += hw[:, P+d] * x[., h, w+d]   (zero outside row)
        mw = ((w_idx + d >= 0) & (w_idx + d < W)).astype(jnp.float32)          # (W,)
        mh_flat = jnp.broadcast_to(mw[None, :], (H, W)).reshape(HW)
        planes.append(jnp.tile(hw_f[:, P + d][:, None] * mh_flat[None, :], (Gb, 1)))
        shifts.append((-d) % HW)
        # vertical tap:   out[., h, w] += vw[:, P+d] * x[., h+d, w]   (zero outside col)
        mhh = ((h_idx + d >= 0) & (h_idx + d < H)).astype(jnp.float32)         # (H,)
        mv_flat = jnp.broadcast_to(mhh[:, None], (H, W)).reshape(HW)
        planes.append(jnp.tile(vw_f[:, P + d][:, None] * mv_flat[None, :], (Gb, 1)))
        shifts.append((-d * W) % HW)
    taps = jnp.stack(planes, axis=0)    # (T, GC, HW) mask-folded weights
    T = taps.shape[0]

    # Centre taps + residual folded into one coefficient; dw biases folded together.
    ctr = jnp.tile(hw_f[:, P] + vw_f[:, P] + 1.0, Gb).reshape(1, GC)
    dwb = jnp.tile((hb + vb).astype(jnp.float32), Gb).reshape(1, GC)
    cwm = cw.astype(jnp.float32)                      # (Cout, C)
    cb2 = cb.reshape(1, Cout).astype(jnp.float32)

    # Tiling: biggest batch tile fitting the VMEM budget; keep >=2 grid steps only
    # when there is more than one TensorCore to shard them over.
    vmem_cap, n_cores = _tpu_budget()
    budget = int(vmem_cap * 0.7)
    per_group_bytes = (GC + Gb * Cout) * HW * 4       # x block + out block per group
    fixed_bytes = 2 * T * GC * HW * 4 + 4 * (2 * GC + Cout * C + Cout) + (1 << 16)
    Bt = _pick_batch_tile(n_groups, per_group_bytes, fixed_bytes, budget,
                          min_steps=2 if n_cores >= 2 else 1)
    grid = (n_groups // Bt,)
    vmem_limit = int(min(
        max(32 << 20, 2 * Bt * per_group_bytes + fixed_bytes + (4 << 20)),
        max(32 << 20, int(vmem_cap * 0.85))))

    kernel = functools.partial(
        _axial_dw_kernel, shifts=tuple(shifts), C=C, Cout=Cout, Gb=Gb,
        use_mxu=(C >= 16))

    out_flat = pl.pallas_call(
        kernel,
        out_shape=jax.ShapeDtypeStruct((n_groups, Gb * Cout, HW), jnp.float32),
        grid_spec=pl.GridSpec(
            grid=grid,
            in_specs=[
                pl.BlockSpec((Bt, GC, HW), lambda b: (b, 0, 0)),     # x (packed, flat)
                pl.BlockSpec((T, GC, HW), lambda b: (0, 0, 0)),      # mask-folded taps
                pl.BlockSpec((1, GC), lambda b: (0, 0)),             # centre coefficient
                pl.BlockSpec((1, GC), lambda b: (0, 0)),             # folded dw bias
                pl.BlockSpec((Cout, C), lambda b: (0, 0)),           # 1x1 conv weight
                pl.BlockSpec((1, Cout), lambda b: (0, 0)),           # 1x1 conv bias
            ],
            out_specs=pl.BlockSpec((Bt, Gb * Cout, HW), lambda b: (b, 0, 0)),
        ),
        compiler_params=pltpu.CompilerParams(
            dimension_semantics=("parallel",),
            vmem_limit_bytes=vmem_limit,
        ),
    )(xf, taps, ctr, dwb, cwm, cb2)

    return out_flat.reshape(B, Cout, H, W)


def _reference(x, hw, hb, vw, vb, cw, cb, kernel_length=5):
    """Plain-JAX reference reproducing the PyTorch conv semantics."""
    B, C, H, W = x.shape
    K = kernel_length
    P = K // 2
    xp = jnp.pad(x, ((0, 0), (0, 0), (P, P), (P, P)))
    h_out = sum(hw[None, :, k, None, None] * xp[:, :, P:P + H, k:k + W] for k in range(K))
    v_out = sum(vw[None, :, k, None, None] * xp[:, :, k:k + H, P:P + W] for k in range(K))
    s = h_out + hb[None, :, None, None] + v_out + vb[None, :, None, None] + x
    r = jnp.maximum(s, 0.0)
    out = jnp.einsum('oc,bchw->bohw', cw, r) + cb[None, :, None, None]
    return out


if __name__ == "__main__":
    B, C, H, W = 2, 4, 16, 16
    Cout = 8
    K = 5

    key = jax.random.PRNGKey(0)
    keys = jax.random.split(key, 8)
    x = jax.random.normal(keys[0], (B, C, H, W), dtype=jnp.float32)

    # same shapes as the torch module, squeezed:
    # horizontal_conv.weight (C,1,1,K) -> (C,K); vertical_conv.weight (C,1,K,1) -> (C,K)
    hw = jax.random.normal(keys[1], (C, K), dtype=jnp.float32) * 0.2
    hb = jax.random.normal(keys[2], (C,), dtype=jnp.float32) * 0.1
    vw = jax.random.normal(keys[3], (C, K), dtype=jnp.float32) * 0.2
    vb = jax.random.normal(keys[4], (C,), dtype=jnp.float32) * 0.1
    # conv.weight (Cout,C,1,1) -> (Cout,C)
    cw = jax.random.normal(keys[5], (Cout, C), dtype=jnp.float32) * 0.3
    cb = jax.random.normal(keys[6], (Cout,), dtype=jnp.float32) * 0.1

    out = axial_depthwise_conv(x, hw, hb, vw, vb, cw, cb, kernel_length=K)
    out = jax.block_until_ready(out)

    ref = _reference(x, hw, hb, vw, vb, cw, cb, kernel_length=K)
    assert out.shape == (B, Cout, H, W)
    assert jnp.allclose(out, ref, atol=1e-5, rtol=1e-5)

    print("KERNEL_OK")
</pallas_src>

<mosaic_0001>
module attributes {stable_mosaic.version = 11 : i64} {
  func.func @_axial_dw_kernel(%arg0: i32, %arg1: memref<1x8x256xf32, #tpu.memory_space<vmem>>, %arg2: memref<8x8x256xf32, #tpu.memory_space<vmem>>, %arg3: memref<1x8xf32, #tpu.memory_space<vmem>>, %arg4: memref<1x8xf32, #tpu.memory_space<vmem>>, %arg5: memref<8x4xf32, #tpu.memory_space<vmem>>, %arg6: memref<1x8xf32, #tpu.memory_space<vmem>>, %arg7: memref<1x16x256xf32, #tpu.memory_space<vmem>>) attributes {dimension_semantics = [#tpu.dimension_semantics<parallel>], iteration_bounds = array<i64: 1>, scalar_prefetch = 0 : i64, scratch_operands = 0 : i64, tpu.core_type = #tpu.core_type<tc>, window_params = [{transform_indices = @transform_0, window_bounds = array<i64: 1, 8, 256>}, {pipeline_mode = #tpu.pipeline_mode<synchronous>, transform_indices = @transform_1, window_bounds = array<i64: 8, 8, 256>}, {pipeline_mode = #tpu.pipeline_mode<synchronous>, transform_indices = @transform_2, window_bounds = array<i64: 1, 8>}, {pipeline_mode = #tpu.pipeline_mode<synchronous>, transform_indices = @transform_3, window_bounds = array<i64: 1, 8>}, {pipeline_mode = #tpu.pipeline_mode<synchronous>, transform_indices = @transform_4, window_bounds = array<i64: 8, 4>}, {pipeline_mode = #tpu.pipeline_mode<synchronous>, transform_indices = @transform_5, window_bounds = array<i64: 1, 8>}, {transform_indices = @transform_6, window_bounds = array<i64: 1, 16, 256>}]} {
    %c0 = arith.constant 0 : index
    %c0_0 = arith.constant 0 : index
    %c0_1 = arith.constant 0 : index
    %0 = vector.load %arg1[%c0, %c0_0, %c0_1] : memref<1x8x256xf32, #tpu.memory_space<vmem>>, vector<1x8x256xf32>
    %c0_2 = arith.constant 0 : index
    %c0_3 = arith.constant 0 : index
    %1 = vector.load %arg3[%c0_2, %c0_3] : memref<1x8xf32, #tpu.memory_space<vmem>>, vector<1x8xf32>
    %c0_4 = arith.constant 0 : index
    %c0_5 = arith.constant 0 : index
    %2 = vector.load %arg4[%c0_4, %c0_5] : memref<1x8xf32, #tpu.memory_space<vmem>>, vector<1x8xf32>
    %3 = vector.shape_cast %1 : vector<1x8xf32> to vector<1x8x1xf32>
    %4 = vector.broadcast %3 : vector<1x8x1xf32> to vector<1x8x256xf32>
    %5 = arith.mulf %4, %0 : vector<1x8x256xf32>
    %c2_i32 = arith.constant 2 : i32
    %6 = tpu.dynamic_rotate %0 by %c2_i32 dim 2 : vector<1x8x256xf32>, i32 -> vector<1x8x256xf32>
    %c0_6 = arith.constant 0 : index
    %c0_7 = arith.constant 0 : index
    %c0_8 = arith.constant 0 : index
    %7 = vector.load %arg2[%c0_6, %c0_7, %c0_8] : memref<8x8x256xf32, #tpu.memory_space<vmem>>, vector<1x8x256xf32>
    %8 = vector.shape_cast %7 : vector<1x8x256xf32> to vector<8x256xf32>
    %9 = vector.shape_cast %8 : vector<8x256xf32> to vector<1x8x256xf32>
    %10 = arith.mulf %9, %6 : vector<1x8x256xf32>
    %11 = arith.addf %5, %10 : vector<1x8x256xf32>
    %c32_i32 = arith.constant 32 : i32
    %12 = tpu.dynamic_rotate %0 by %c32_i32 dim 2 : vector<1x8x256xf32>, i32 -> vector<1x8x256xf32>
    %c1 = arith.constant 1 : index
    %c0_9 = arith.constant 0 : index
    %c0_10 = arith.constant 0 : index
    %13 = vector.load %arg2[%c1, %c0_9, %c0_10] : memref<8x8x256xf32, #tpu.memory_space<vmem>>, vector<1x8x256xf32>
    %14 = vector.shape_cast %13 : vector<1x8x256xf32> to vector<8x256xf32>
    %15 = vector.shape_cast %14 : vector<8x256xf32> to vector<1x8x256xf32>
    %16 = arith.mulf %15, %12 : vector<1x8x256xf32>
    %c1_i32 = arith.constant 1 : i32
    %17 = tpu.dynamic_rotate %0 by %c1_i32 dim 2 : vector<1x8x256xf32>, i32 -> vector<1x8x256xf32>
    %c2 = arith.constant 2 : index
    %c0_11 = arith.constant 0 : index
    %c0_12 = arith.constant 0 : index
    %18 = vector.load %arg2[%c2, %c0_11, %c0_12] : memref<8x8x256xf32, #tpu.memory_space<vmem>>, vector<1x8x256xf32>
    %19 = vector.shape_cast %18 : vector<1x8x256xf32> to vector<8x256xf32>
    %20 = vector.shape_cast %19 : vector<8x256xf32> to vector<1x8x256xf32>
    %21 = arith.mulf %20, %17 : vector<1x8x256xf32>
    %22 = arith.addf %11, %21 : vector<1x8x256xf32>
    %c16_i32 = arith.constant 16 : i32
    %23 = tpu.dynamic_rotate %0 by %c16_i32 dim 2 : vector<1x8x256xf32>, i32 -> vector<1x8x256xf32>
    %c3 = arith.constant 3 : index
    %c0_13 = arith.constant 0 : index
    %c0_14 = arith.constant 0 : index
    %24 = vector.load %arg2[%c3, %c0_13, %c0_14] : memref<8x8x256xf32, #tpu.memory_space<vmem>>, vector<1x8x256xf32>
    %25 = vector.shape_cast %24 : vector<1x8x256xf32> to vector<8x256xf32>
    %26 = vector.shape_cast %25 : vector<8x256xf32> to vector<1x8x256xf32>
    %27 = arith.mulf %26, %23 : vector<1x8x256xf32>
    %28 = arith.addf %16, %27 : vector<1x8x256xf32>
    %c255_i32 = arith.constant 255 : i32
    %29 = tpu.dynamic_rotate %0 by %c255_i32 dim 2 : vector<1x8x256xf32>, i32 -> vector<1x8x256xf32>
    %c4 = arith.constant 4 : index
    %c0_15 = arith.constant 0 : index
    %c0_16 = arith.constant 0 : index
    %30 = vector.load %arg2[%c4, %c0_15, %c0_16] : memref<8x8x256xf32, #tpu.memory_space<vmem>>, vector<1x8x256xf32>
    %31 = vector.shape_cast %30 : vector<1x8x256xf32> to vector<8x256xf32>
    %32 = vector.shape_cast %31 : vector<8x256xf32> to vector<1x8x256xf32>
    %33 = arith.mulf %32, %29 : vector<1x8x256xf32>
    %34 = arith.addf %22, %33 : vector<1x8x256xf32>
    %c240_i32 = arith.constant 240 : i32
    %35 = tpu.dynamic_rotate %0 by %c240_i32 dim 2 : vector<1x8x256xf32>, i32 -> vector<1x8x256xf32>
    %c5 = arith.constant 5 : index
    %c0_17 = arith.constant 0 : index
    %c0_18 = arith.constant 0 : index
    %36 = vector.load %arg2[%c5, %c0_17, %c0_18] : memref<8x8x256xf32, #tpu.memory_space<vmem>>, vector<1x8x256xf32>
    %37 = vector.shape_cast %36 : vector<1x8x256xf32> to vector<8x256xf32>
    %38 = vector.shape_cast %37 : vector<8x256xf32> to vector<1x8x256xf32>
    %39 = arith.mulf %38, %35 : vector<1x8x256xf32>
    %40 = arith.addf %28, %39 : vector<1x8x256xf32>
    %c254_i32 = arith.constant 254 : i32
    %41 = tpu.dynamic_rotate %0 by %c254_i32 dim 2 : vector<1x8x256xf32>, i32 -> vector<1x8x256xf32>
    %c6 = arith.constant 6 : index
    %c0_19 = arith.constant 0 : index
    %c0_20 = arith.constant 0 : index
    %42 = vector.load %arg2[%c6, %c0_19, %c0_20] : memref<8x8x256xf32, #tpu.memory_space<vmem>>, vector<1x8x256xf32>
    %43 = vector.shape_cast %42 : vector<1x8x256xf32> to vector<8x256xf32>
    %44 = vector.shape_cast %43 : vector<8x256xf32> to vector<1x8x256xf32>
    %45 = arith.mulf %44, %41 : vector<1x8x256xf32>
    %46 = arith.addf %34, %45 : vector<1x8x256xf32>
    %c224_i32 = arith.constant 224 : i32
    %47 = tpu.dynamic_rotate %0 by %c224_i32 dim 2 : vector<1x8x256xf32>, i32 -> vector<1x8x256xf32>
    %c7 = arith.constant 7 : index
    %c0_21 = arith.constant 0 : index
    %c0_22 = arith.constant 0 : index
    %48 = vector.load %arg2[%c7, %c0_21, %c0_22] : memref<8x8x256xf32, #tpu.memory_space<vmem>>, vector<1x8x256xf32>
    %49 = vector.shape_cast %48 : vector<1x8x256xf32> to vector<8x256xf32>
    %50 = vector.shape_cast %49 : vector<8x256xf32> to vector<1x8x256xf32>
    %51 = arith.mulf %50, %47 : vector<1x8x256xf32>
    %52 = arith.addf %40, %51 : vector<1x8x256xf32>
    %53 = arith.addf %46, %52 : vector<1x8x256xf32>
    %54 = vector.shape_cast %2 : vector<1x8xf32> to vector<1x8x1xf32>
    %55 = vector.broadcast %54 : vector<1x8x1xf32> to vector<1x8x256xf32>
    %56 = arith.addf %53, %55 : vector<1x8x256xf32>
    %cst = arith.constant 0.000000e+00 : f32
    %57 = vector.broadcast %cst : f32 to vector<1x8x256xf32>
    %58 = arith.maximumf %56, %57 : vector<1x8x256xf32>
    %c0_23 = arith.constant 0 : index
    %c0_24 = arith.constant 0 : index
    %59 = vector.load %arg5[%c0_23, %c0_24] : memref<8x4xf32, #tpu.memory_space<vmem>>, vector<8x4xf32>
    %c0_25 = arith.constant 0 : index
    %c0_26 = arith.constant 0 : index
    %60 = vector.load %arg6[%c0_25, %c0_26] : memref<1x8xf32, #tpu.memory_space<vmem>>, vector<1x8xf32>
    %61 = vector.extract_strided_slice %58 {offsets = [0, 0, 0], sizes = [1, 4, 256], strides = [1, 1, 1]} : vector<1x8x256xf32> to vector<1x4x256xf32>
    %62 = vector.shape_cast %60 : vector<1x8xf32> to vector<1x8x1xf32>
    %63 = vector.extract_strided_slice %59 {offsets = [0, 0], sizes = [8, 1], strides = [1, 1]} : vector<8x4xf32> to vector<8x1xf32>
    %64 = vector.shape_cast %63 : vector<8x1xf32> to vector<1x8x1xf32>
    %65 = vector.extract_strided_slice %61 {offsets = [0, 0, 0], sizes = [1, 1, 256], strides = [1, 1, 1]} : vector<1x4x256xf32> to vector<1x1x256xf32>
    %66 = vector.broadcast %64 : vector<1x8x1xf32> to vector<1x8x256xf32>
    %67 = vector.broadcast %65 : vector<1x1x256xf32> to vector<1x8x256xf32>
    %68 = arith.mulf %66, %67 : vector<1x8x256xf32>
    %69 = vector.broadcast %62 : vector<1x8x1xf32> to vector<1x8x256xf32>
    %70 = arith.addf %69, %68 : vector<1x8x256xf32>
    %71 = vector.extract_strided_slice %59 {offsets = [0, 1], sizes = [8, 1], strides = [1, 1]} : vector<8x4xf32> to vector<8x1xf32>
    %72 = vector.shape_cast %71 : vector<8x1xf32> to vector<1x8x1xf32>
    %73 = vector.extract_strided_slice %61 {offsets = [0, 1, 0], sizes = [1, 1, 256], strides = [1, 1, 1]} : vector<1x4x256xf32> to vector<1x1x256xf32>
    %74 = vector.broadcast %72 : vector<1x8x1xf32> to vector<1x8x256xf32>
    %75 = vector.broadcast %73 : vector<1x1x256xf32> to vector<1x8x256xf32>
    %76 = arith.mulf %74, %75 : vector<1x8x256xf32>
    %77 = vector.extract_strided_slice %59 {offsets = [0, 2], sizes = [8, 1], strides = [1, 1]} : vector<8x4xf32> to vector<8x1xf32>
    %78 = vector.shape_cast %77 : vector<8x1xf32> to vector<1x8x1xf32>
    %79 = vector.extract_strided_slice %61 {offsets = [0, 2, 0], sizes = [1, 1, 256], strides = [1, 1, 1]} : vector<1x4x256xf32> to vector<1x1x256xf32>
    %80 = vector.broadcast %78 : vector<1x8x1xf32> to vector<1x8x256xf32>
    %81 = vector.broadcast %79 : vector<1x1x256xf32> to vector<1x8x256xf32>
    %82 = arith.mulf %80, %81 : vector<1x8x256xf32>
    %83 = arith.addf %70, %82 : vector<1x8x256xf32>
    %84 = vector.extract_strided_slice %59 {offsets = [0, 3], sizes = [8, 1], strides = [1, 1]} : vector<8x4xf32> to vector<8x1xf32>
    %85 = vector.shape_cast %84 : vector<8x1xf32> to vector<1x8x1xf32>
    %86 = vector.extract_strided_slice %61 {offsets = [0, 3, 0], sizes = [1, 1, 256], strides = [1, 1, 1]} : vector<1x4x256xf32> to vector<1x1x256xf32>
    %87 = vector.broadcast %85 : vector<1x8x1xf32> to vector<1x8x256xf32>
    %88 = vector.broadcast %86 : vector<1x1x256xf32> to vector<1x8x256xf32>
    %89 = arith.mulf %87, %88 : vector<1x8x256xf32>
    %90 = arith.addf %76, %89 : vector<1x8x256xf32>
    %91 = arith.addf %83, %90 : vector<1x8x256xf32>
    %c0_27 = arith.constant 0 : index
    %c0_28 = arith.constant 0 : index
    %c0_29 = arith.constant 0 : index
    %92 = vector.load %arg7[%c0_27, %c0_28, %c0_29] : memref<1x16x256xf32, #tpu.memory_space<vmem>>, vector<1x8x256xf32>
    tpu.vector_store %arg7[%c0_27, %c0_28, %c0_29], %91 {strides = array<i32>} : memref<1x16x256xf32, #tpu.memory_space<vmem>>, vector<1x8x256xf32>,
    %93 = vector.extract_strided_slice %58 {offsets = [0, 4, 0], sizes = [1, 4, 256], strides = [1, 1, 1]} : vector<1x8x256xf32> to vector<1x4x256xf32>
    %94 = vector.shape_cast %60 : vector<1x8xf32> to vector<1x8x1xf32>
    %95 = vector.extract_strided_slice %59 {offsets = [0, 0], sizes = [8, 1], strides = [1, 1]} : vector<8x4xf32> to vector<8x1xf32>
    %96 = vector.shape_cast %95 : vector<8x1xf32> to vector<1x8x1xf32>
    %97 = vector.extract_strided_slice %93 {offsets = [0, 0, 0], sizes = [1, 1, 256], strides = [1, 1, 1]} : vector<1x4x256xf32> to vector<1x1x256xf32>
    %98 = vector.broadcast %96 : vector<1x8x1xf32> to vector<1x8x256xf32>
    %99 = vector.broadcast %97 : vector<1x1x256xf32> to vector<1x8x256xf32>
    %100 = arith.mulf %98, %99 : vector<1x8x256xf32>
    %101 = vector.broadcast %94 : vector<1x8x1xf32> to vector<1x8x256xf32>
    %102 = arith.addf %101, %100 : vector<1x8x256xf32>
    %103 = vector.extract_strided_slice %59 {offsets = [0, 1], sizes = [8, 1], strides = [1, 1]} : vector<8x4xf32> to vector<8x1xf32>
    %104 = vector.shape_cast %103 : vector<8x1xf32> to vector<1x8x1xf32>
    %105 = vector.extract_strided_slice %93 {offsets = [0, 1, 0], sizes = [1, 1, 256], strides = [1, 1, 1]} : vector<1x4x256xf32> to vector<1x1x256xf32>
    %106 = vector.broadcast %104 : vector<1x8x1xf32> to vector<1x8x256xf32>
    %107 = vector.broadcast %105 : vector<1x1x256xf32> to vector<1x8x256xf32>
    %108 = arith.mulf %106, %107 : vector<1x8x256xf32>
    %109 = vector.extract_strided_slice %59 {offsets = [0, 2], sizes = [8, 1], strides = [1, 1]} : vector<8x4xf32> to vector<8x1xf32>
    %110 = vector.shape_cast %109 : vector<8x1xf32> to vector<1x8x1xf32>
    %111 = vector.extract_strided_slice %93 {offsets = [0, 2, 0], sizes = [1, 1, 256], strides = [1, 1, 1]} : vector<1x4x256xf32> to vector<1x1x256xf32>
    %112 = vector.broadcast %110 : vector<1x8x1xf32> to vector<1x8x256xf32>
    %113 = vector.broadcast %111 : vector<1x1x256xf32> to vector<1x8x256xf32>
    %114 = arith.mulf %112, %113 : vector<1x8x256xf32>
    %115 = arith.addf %102, %114 : vector<1x8x256xf32>
    %116 = vector.extract_strided_slice %59 {offsets = [0, 3], sizes = [8, 1], strides = [1, 1]} : vector<8x4xf32> to vector<8x1xf32>
    %117 = vector.shape_cast %116 : vector<8x1xf32> to vector<1x8x1xf32>
    %118 = vector.extract_strided_slice %93 {offsets = [0, 3, 0], sizes = [1, 1, 256], strides = [1, 1, 1]} : vector<1x4x256xf32> to vector<1x1x256xf32>
    %119 = vector.broadcast %117 : vector<1x8x1xf32> to vector<1x8x256xf32>
    %120 = vector.broadcast %118 : vector<1x1x256xf32> to vector<1x8x256xf32>
    %121 = arith.mulf %119, %120 : vector<1x8x256xf32>
    %122 = arith.addf %108, %121 : vector<1x8x256xf32>
    %123 = arith.addf %115, %122 : vector<1x8x256xf32>
    %c0_30 = arith.constant 0 : index
    %c8 = arith.constant 8 : index
    %c0_31 = arith.constant 0 : index
    %124 = vector.load %arg7[%c0_30, %c8, %c0_31] : memref<1x16x256xf32, #tpu.memory_space<vmem>>, vector<1x8x256xf32>
    tpu.vector_store %arg7[%c0_30, %c8, %c0_31], %123 {strides = array<i32>} : memref<1x16x256xf32, #tpu.memory_space<vmem>>, vector<1x8x256xf32>,
    return
  }
  func.func @transform_0(%arg0: i32) -> (i32, i32, i32) {
    %c0_i32 = arith.constant 0 : i32
    %c0_i32_0 = arith.constant 0 : i32
    %c0_i32_1 = arith.constant 0 : i32
    return %arg0, %c0_i32, %c0_i32_0 : i32, i32, i32
  }
  func.func @transform_1(%arg0: i32) -> (i32, i32, i32) {
    %c0_i32 = arith.constant 0 : i32
    %c0_i32_0 = arith.constant 0 : i32
    %c0_i32_1 = arith.constant 0 : i32
    %c0_i32_2 = arith.constant 0 : i32
    return %c0_i32, %c0_i32_0, %c0_i32_1 : i32, i32, i32
  }
  func.func @transform_2(%arg0: i32) -> (i32, i32) {
    %c0_i32 = arith.constant 0 : i32
    %c0_i32_0 = arith.constant 0 : i32
    %c0_i32_1 = arith.constant 0 : i32
    return %c0_i32, %c0_i32_0 : i32, i32
  }
  func.func @transform_3(%arg0: i32) -> (i32, i32) {
    %c0_i32 = arith.constant 0 : i32
    %c0_i32_0 = arith.constant 0 : i32
    %c0_i32_1 = arith.constant 0 : i32
    return %c0_i32, %c0_i32_0 : i32, i32
  }
  func.func @transform_4(%arg0: i32) -> (i32, i32) {
    %c0_i32 = arith.constant 0 : i32
    %c0_i32_0 = arith.constant 0 : i32
    %c0_i32_1 = arith.constant 0 : i32
    return %c0_i32, %c0_i32_0 : i32, i32
  }
  func.func @transform_5(%arg0: i32) -> (i32, i32) {
    %c0_i32 = arith.constant 0 : i32
    %c0_i32_0 = arith.constant 0 : i32
    %c0_i32_1 = arith.constant 0 : i32
    return %c0_i32, %c0_i32_0 : i32, i32
  }
  func.func @transform_6(%arg0: i32) -> (i32, i32, i32) {
    %c0_i32 = arith.constant 0 : i32
    %c0_i32_0 = arith.constant 0 : i32
    %c0_i32_1 = arith.constant 0 : i32
    return %arg0, %c0_i32, %c0_i32_0 : i32, i32, i32
  }
}

</mosaic_0001>

<bundles_post_ra>
// kernel: tpu_custom_call.1
= control target key start
LH: loop header
LB: loop body
LE: loop exit
PB: predicated region body
PF: predicated region fallthrough
CT: control target
= control target key end

     0   :  { %11 = vsyncpa [#allocation3], 0  ;;  %s558_s0 = inlined_call_operand.hbm [shape: f32[1,8,256], index: 0, kind: input, shape index: {}]   ;;  %s559_s1 = inlined_call_operand.hbm [shape: f32[8,8,256], index: 1, kind: input, shape index: {}]   ;;  %s560_s2 = inlined_call_operand.vmem [shape: f32[1,8], index: 2, kind: input, shape index: {}]   ;;  %s561_s3 = inlined_call_operand.vmem [shape: f32[1,8], index: 3, kind: input, shape index: {}]   ;;  %s562_s4 = inlined_call_operand.vmem [shape: f32[8,4], index: 4, kind: input, shape index: {}]   ;;  %s563_s5 = inlined_call_operand.vmem [shape: f32[1,8], index: 5, kind: input, shape index: {}]   ;;  %s564_s6 = inlined_call_operand.hbm [shape: f32[1,16,256], index: 6, kind: output, shape index: {}]  }
   0x1   :  { %12 = vsyncpa [#allocation6], 0 }
   0x2   :  { %13 = vsyncpa [#allocation4], 0  ;;  %s420_s21 = smov [#allocation2]   ;;  %s421_s23 = smov [#allocation5]  }
   0x3   :  { %s20_s22 = sshll.u32 %s420_s21, 4  ;;  %s29_s24 = sshll.u32 %s421_s23, 4  ;;  %s21_s22 = int_to_ptr.vmem [resolvable:$true] %s20_s22  ;;  %s30_s24 = int_to_ptr.vmem [resolvable:$true] %s29_s24 }
   0x4   :  { %s362_s25 = scalar_lea.vmem %s21_s22, 256  ;;  %p367_p1 = scmp.lt.s32.totalorder %s21_s22, %s21_s22 }
   0x5   :  { %p363_p0 = scmp.ne.s32.totalorder %s21_s22, %s362_s25  ;;  %p368_p2 = scmp.lt.s32.totalorder %s362_s25, %s362_s25 }
   0x7   :  { %p369_p3 = por %p368_p2, %p367_p1 }
   0x9   :  { %p370_p4 = pnand %p369_p3, %p363_p0 }
   0xb   :  { %373 = shalt.err (!%p370_p4)
}
   0xc   :  { %23 = dma.hbm_to_vmem [thread:$0]  %s558_s0, 256, %s21_s22, [#allocation3]  }
   0xd   :  { %s382_s28 = scalar_lea.vmem %s30_s24, 2048  ;;  %p387_p6 = scmp.lt.s32.totalorder %s30_s24, %s30_s24 }
   0xe   :  { %p383_p5 = scmp.ne.s32.totalorder %s30_s24, %s382_s28  ;;  %p388_p7 = scmp.lt.s32.totalorder %s382_s28, %s382_s28 }
  0x10   :  { %p389_p8 = por %p388_p7, %p387_p6 }
  0x12   :  { %p390_p9 = pnand %p389_p8, %p383_p5 }
  0x14   :  { %393 = shalt.err (!%p390_p9)
}
  0x15   :  { %s422_s29 = smov 256   ;;  %s423_s30 = smov 16  }
  0x16   :  { %35 = dma.hbm_to_vmem [thread:$0]  %s559_s1, 2048, %s30_s24, [#allocation6], %s422_s29, %s422_s29, %s423_s30  }
  0x17   :  { %414 = dma.done.wait [#allocation3], 256  }
  0x18   :  { %415 = vsyncadd [#allocation3], 4294967040 }
  0x19   :  { %416 = dma.done.wait [#allocation6], 2048  }
  0x1a   :  { %417 = vsyncadd [#allocation6], 4294965248  ;;  %v424_v0 = vmov 1   ;;  %v425_v1 = vmov 0   ;;  %v331_v2 = vld [vmem:[%s560_s2] ss:$0 sm:$0xff]  ;;  %v67_v16 = vlaneseq }
  0x1b   :  { %351 = vset.pattern.permute.xlu1 %v424_v0  ;;  %350 = vset.pattern.permute.xlu0 %v425_v1  ;;  %v483_v3 = vld [vmem:[#allocation2] sm:$0xff]  ;;  %s426_s10 = smov 2   ;;  %v486_v4 = vld [vmem:[#allocation2 + $0x8] sm:$0xff]  ;;  %s427_s1 = smov 32   ;;  %v433_v7 = vmov 2   ;;  %v434_v8 = vmov 3  }
  0x1c   :  { %59 = vbcast.lane.b32.xlu1 %v331_v2, 256  ;;  %63 = vrot.lane.b32.xlu0 %v483_v3, %s426_s10  ;;  %s428_s11 = smov 1   ;;  %s429_s2 = smov 127   ;;  %v332_v5 = vld [vmem:[%s561_s3] ss:$0 sm:$0xff]  ;;  %v515_v19 = vand.u32 127, %v67_v16 }
  0x1d   :  { %s430_s12 = smov 112   ;;  %s431_s13 = smov 126   ;;  %v187_v6 = vld [vmem:[%s562_s4] sm:$0xff]  ;;  %v72_v24 = vld [vmem:[#allocation5] sm:$0xff]  ;;  %v73_v25 = vld [vmem:[#allocation5 + $0x8] sm:$0xff] }
  0x1e   :  { %s432_s14 = smov 96   ;;  %v333_v9 = vld [vmem:[%s563_s5] ss:$0 sm:$0xff]  ;;  %vm69_vm0 = vcmp.lt.s32.totalorder %v515_v19, 2  ;;  %vm94_vm1 = vcmp.lt.s32.totalorder %v515_v19, 1  ;;  %vm82_vm2 = vcmp.lt.s32.totalorder %v515_v19, 32 }
  0x1f   :  { %vm108_vm3 = vcmp.lt.s32.totalorder %v515_v19, 16  ;;  %vm122_vm4 = vcmp.lt.s32.totalorder %v515_v19, 127  ;;  %vm136_vm5 = vcmp.lt.s32.totalorder %v515_v19, 112  ;;  %vm150_vm6 = vcmp.lt.s32.totalorder %v515_v19, 126  ;;  %v98_v30 = vld [vmem:[#allocation5 + $0x20] sm:$0xff]  ;;  %v99_v31 = vld [vmem:[#allocation5 + $0x28] sm:$0xff] }
  0x20   :  { %78 = vrot.lane.b32.xlu1 %v483_v3, %s427_s1  ;;  %65 = vrot.lane.b32.xlu0 %v486_v4, %s426_s10  ;;  %vm164_vm7 = vcmp.lt.s32.totalorder %v515_v19, 96  ;;  %v112_v37 = vld [vmem:[#allocation5 + $0x30] sm:$0xff]  ;;  %v113_v38 = vld [vmem:[#allocation5 + $0x38] sm:$0xff]  ;;  %v126_v44 = vld [vmem:[#allocation5 + $0x40] sm:$0xff]  ;;  %s435_s3 = smov [#allocation7]  }
  0x21   :  { %v86_v41 = vld [vmem:[#allocation5 + $0x10] sm:$0xff]  ;;  %v127_v45 = vld [vmem:[#allocation5 + $0x48] sm:$0xff]  ;;  %v87_v49 = vld [vmem:[#allocation5 + $0x18] sm:$0xff]  ;;  %s318_s4 = sshll.u32 %s435_s3, 4  ;;  %s319_s4 = int_to_ptr.vmem [resolvable:$true] %s318_s4 }
  0x22   :  { %v140_v52 = vld [vmem:[#allocation5 + $0x50] sm:$0xff]  ;;  %v141_v53 = vld [vmem:[#allocation5 + $0x58] sm:$0xff]  ;;  %v154_v63 = vld [vmem:[#allocation5 + $0x60] sm:$0xff]  ;;  %s394_s5 = scalar_lea.vmem %s319_s4, 512  ;;  %p399_p11 = scmp.lt.s32.totalorder %s319_s4, %s319_s4 }
  0x23   :  { %v155_v0 = vld [vmem:[#allocation5 + $0x68] sm:$0xff]  ;;  %p395_p10 = scmp.ne.s32.totalorder %s319_s4, %s394_s5  ;;  %p400_p12 = scmp.lt.s32.totalorder %s394_s5, %s394_s5 }
  0x24   :  { %90 = vrot.lane.b32.xlu1 %v483_v3, %s428_s11  ;;  %80 = vrot.lane.b32.xlu0 %v486_v4, %s427_s1 }
  0x25   :  { %p401_p13 = por %p400_p12, %p399_p11 }
  0x27   :  { %p402_p0 = pnand %p401_p13, %p395_p10 }
  0x28   :  { %104 = vrot.lane.b32.xlu1 %v483_v3, %s423_s30  ;;  %92 = vrot.lane.b32.xlu0 %v486_v4, %s428_s11 }
  0x2c   :  { %118 = vrot.lane.b32.xlu1 %v483_v3, %s429_s2  ;;  %106 = vrot.lane.b32.xlu0 %v486_v4, %s423_s30 }
  0x30   :  { %132 = vrot.lane.b32.xlu1 %v483_v3, %s430_s12  ;;  %120 = vrot.lane.b32.xlu0 %v486_v4, %s429_s2 }
  0x34   :  { %146 = vrot.lane.b32.xlu1 %v483_v3, %s431_s13  ;;  %134 = vrot.lane.b32.xlu0 %v486_v4, %s430_s12 }
  0x38   :  { %160 = vrot.lane.b32.xlu1 %v483_v3, %s432_s14  ;;  %148 = vrot.lane.b32.xlu0 %v486_v4, %s431_s13 }
  0x3c   :  { %181 = vbcast.lane.b32.xlu1 %v332_v5, 256  ;;  %162 = vrot.lane.b32.xlu0 %v486_v4, %s432_s14 }
  0x40   :  { %214 = vperm.xlu1 %351, %v187_v6   ;;  %198 = vperm.xlu0 %350, %v187_v6  }
  0x44   :  { %352 = vset.pattern.permute.xlu1 %v433_v7  ;;  %353 = vset.pattern.permute.xlu0 %v434_v8 }
  0x45   :  { %228 = vperm.xlu1 %352, %v187_v6   ;;  %244 = vperm.xlu0 %353, %v187_v6  }
  0x49   :  { %194 = vbcast.lane.b32.xlu1 %v333_v9, 256  ;;  %v168_v9 = vld [vmem:[#allocation5 + $0x70] sm:$0xff] }
  0x8e   :  { %v60_v10 = vpop.permute.xlu1 %59  ;;  %v64_v11 = vpop.permute.xlu0 %63 }
  0x8f   :  { %v61_v35 = vmul.f32 %v60_v10, %v483_v3  ;;  %v62_v36 = vmul.f32 %v60_v10, %v486_v4  ;;  %v169_v10 = vld [vmem:[#allocation5 + $0x78] sm:$0xff] }
  0x92   :  { %v79_v12 = vpop.permute.xlu1 %78  ;;  %v66_v13 = vpop.permute.xlu0 %65 }
  0x93   :  { %v70_v26 = vsel %vm69_vm0, %v64_v11, %v66_v13  ;;  %v71_v27 = vsel %vm69_vm0, %v66_v13, %v64_v11 }
  0x94   :  { %v74_v28 = vmul.f32 %v72_v24, %v71_v27  ;;  %v75_v29 = vmul.f32 %v73_v25, %v70_v26 }
  0x96   :  { %v91_v14 = vpop.permute.xlu1 %90  ;;  %v81_v15 = vpop.permute.xlu0 %80  ;;  %v76_v56 = vadd.f32 %v74_v28, %v61_v35  ;;  %v77_v57 = vadd.f32 %v75_v29, %v62_v36 }
  0x97   :  { %v83_v42 = vsel %vm82_vm2, %v79_v12, %v81_v15  ;;  %v84_v43 = vsel %vm82_vm2, %v81_v15, %v79_v12 }
  0x98   :  { %v88_v3 = vmul.f32 %v86_v41, %v84_v43  ;;  %v89_v4 = vmul.f32 %v87_v49, %v83_v42 }
  0x9a   :  { %v105_v17 = vpop.permute.xlu1 %104  ;;  %v93_v18 = vpop.permute.xlu0 %92 }
  0x9b   :  { %v95_v32 = vsel %vm94_vm1, %v91_v14, %v93_v18  ;;  %v96_v33 = vsel %vm94_vm1, %v93_v18, %v91_v14 }
  0x9c   :  { %v100_v50 = vmul.f32 %v98_v30, %v96_v33  ;;  %v101_v51 = vmul.f32 %v99_v31, %v95_v32  ;;  %v202_v33 = vshrl.u32 %v67_v16, 7 }
  0x9e   :  { %v119_v20 = vpop.permute.xlu1 %118  ;;  %v107_v21 = vpop.permute.xlu0 %106  ;;  %v102_v7 = vadd.f32 %v100_v50, %v76_v56  ;;  %v103_v8 = vadd.f32 %v101_v51, %v77_v57  ;;  %v277_v19 = vsub.s32 5, %v202_v33  ;;  %v287_v41 = vsub.s32 6, %v202_v33 }
  0x9f   :  { %v109_v39 = vsel %vm108_vm3, %v105_v17, %v107_v21  ;;  %v110_v40 = vsel %vm108_vm3, %v107_v21, %v105_v17 }
  0xa0   :  { %v114_v58 = vmul.f32 %v112_v37, %v110_v40  ;;  %v115_v59 = vmul.f32 %v113_v38, %v109_v39  ;;  %v219_v39 = vsub.s32 1, %v202_v33  ;;  %v233_v40 = vsub.s32 2, %v202_v33 }
  0xa2   :  { %v133_v22 = vpop.permute.xlu1 %132  ;;  %v121_v23 = vpop.permute.xlu0 %120  ;;  %v116_v11 = vadd.f32 %v114_v58, %v88_v3  ;;  %v117_v12 = vadd.f32 %v115_v59, %v89_v4 }
  0xa3   :  { %v123_v46 = vsel %vm122_vm4, %v119_v20, %v121_v23  ;;  %v124_v47 = vsel %vm122_vm4, %v121_v23, %v119_v20 }
  0xa4   :  { %v128_v61 = vmul.f32 %v126_v44, %v123_v46  ;;  %v129_v62 = vmul.f32 %v127_v45, %v124_v47  ;;  %v203_v44 = vsub.s32 0, %v202_v33  ;;  %v265_v45 = vsub.s32 4, %v202_v33 }
  0xa5   :  { %v249_v46 = vsub.s32 3, %v202_v33  ;;  %v299_v47 = vsub.s32 7, %v202_v33 }
  0xa6   :  { %v135_v34 = vpop.permute.xlu0 %134  ;;  %v147_v48 = vpop.permute.xlu1 %146  ;;  %v130_v18 = vadd.f32 %v128_v61, %v102_v7  ;;  %v131_v20 = vadd.f32 %v129_v62, %v103_v8 }
  0xa7   :  { %v137_v54 = vsel %vm136_vm5, %v133_v22, %v135_v34  ;;  %v138_v55 = vsel %vm136_vm5, %v135_v34, %v133_v22 }
  0xa8   :  { %v142_v5 = vmul.f32 %v140_v52, %v137_v54  ;;  %v143_v6 = vmul.f32 %v141_v53, %v138_v55 }
  0xaa   :  { %v149_v60 = vpop.permute.xlu0 %148  ;;  %v161_v13 = vpop.permute.xlu1 %160  ;;  %v144_v23 = vadd.f32 %v142_v5, %v116_v11  ;;  %v145_v24 = vadd.f32 %v143_v6, %v117_v12 }
  0xab   :  { %v151_v1 = vsel %vm150_vm6, %v147_v48, %v149_v60  ;;  %v152_v2 = vsel %vm150_vm6, %v149_v60, %v147_v48 }
  0xac   :  { %v156_v14 = vmul.f32 %v154_v63, %v151_v1  ;;  %v157_v15 = vmul.f32 %v155_v0, %v152_v2 }
  0xae   :  { %v163_v17 = vpop.permute.xlu0 %162  ;;  %v158_v27 = vadd.f32 %v156_v14, %v130_v18  ;;  %v159_v28 = vadd.f32 %v157_v15, %v131_v20  ;;  %v182_v34 = vpop.permute.xlu1 %181 }
  0xaf   :  { %v165_v21 = vsel %vm164_vm7, %v161_v13, %v163_v17  ;;  %v166_v22 = vsel %vm164_vm7, %v163_v17, %v161_v13 }
  0xb0   :  { %v170_v25 = vmul.f32 %v168_v9, %v165_v21  ;;  %v171_v26 = vmul.f32 %v169_v10, %v166_v22 }
  0xb2   :  { %v172_v29 = vadd.f32 %v170_v25, %v144_v23  ;;  %v173_v30 = vadd.f32 %v171_v26, %v145_v24 }
  0xb4   :  { %v174_v31 = vadd.f32 %v172_v29, %v158_v27  ;;  %v175_v32 = vadd.f32 %v173_v30, %v159_v28 }
  0xb6   :  { %v183_v35 = vadd.f32 %v182_v34, %v174_v31  ;;  %v184_v36 = vadd.f32 %v182_v34, %v175_v32 }
  0xb8   :  { %v185_v37 = vmax.f32 %v183_v35, 0.0  ;;  %v186_v38 = vmax.f32 %v184_v36, 0.0 }
  0xba   :  { %v220_v48 = vrot.slane %v185_v37, %v219_v39  ;;  %v224_v49 = vrot.slane %v186_v38, %v219_v39  ;;  %v278_v50 = vrot.slane %v185_v37, %v277_v19  ;;  %v282_v51 = vrot.slane %v186_v38, %v277_v19 }
  0xbb   :  { %v215_v42 = vpop.permute.xlu1 %214  ;;  %v199_v43 = vpop.permute.xlu0 %198  ;;  %v234_v16 = vrot.slane %v185_v37, %v233_v40  ;;  %v238_v52 = vrot.slane %v186_v38, %v233_v40  ;;  %v288_v53 = vrot.slane %v185_v37, %v287_v41  ;;  %v292_v54 = vrot.slane %v186_v38, %v287_v41 }
  0xbc   :  { %v204_v55 = vrot.slane %v185_v37, %v203_v44  ;;  %v208_v56 = vrot.slane %v186_v38, %v203_v44  ;;  %v266_v57 = vrot.slane %v185_v37, %v265_v45  ;;  %v270_v58 = vrot.slane %v186_v38, %v265_v45 }
  0xbd   :  { %v254_v60 = vrot.slane %v186_v38, %v249_v46  ;;  %v304_v61 = vrot.slane %v186_v38, %v299_v47  ;;  %v250_v63 = vrot.slane %v185_v37, %v249_v46  ;;  %v300_v0 = vrot.slane %v185_v37, %v299_v47 }
  0xbe   :  { %v225_v1 = vmul.f32 %v220_v48, %v215_v42  ;;  %v226_v2 = vmul.f32 %v224_v49, %v215_v42  ;;  %v283_v3 = vmul.f32 %v278_v50, %v215_v42  ;;  %v284_v4 = vmul.f32 %v282_v51, %v215_v42 }
  0xbf   :  { %v209_v9 = vmul.f32 %v204_v55, %v199_v43  ;;  %v210_v10 = vmul.f32 %v208_v56, %v199_v43  ;;  %v271_v11 = vmul.f32 %v266_v57, %v199_v43  ;;  %v272_v12 = vmul.f32 %v270_v58, %v199_v43 }
  0xc0   :  { %v229_v59 = vpop.permute.xlu1 %228  ;;  %v245_v62 = vpop.permute.xlu0 %244 }
  0xc1   :  { %v255_v5 = vmul.f32 %v250_v63, %v245_v62  ;;  %v256_v6 = vmul.f32 %v254_v60, %v245_v62  ;;  %v305_v7 = vmul.f32 %v300_v0, %v245_v62  ;;  %v306_v8 = vmul.f32 %v304_v61, %v245_v62 }
  0xc2   :  { %v239_v13 = vmul.f32 %v234_v16, %v229_v59  ;;  %v240_v14 = vmul.f32 %v238_v52, %v229_v59  ;;  %v293_v15 = vmul.f32 %v288_v53, %v229_v59  ;;  %v294_v17 = vmul.f32 %v292_v54, %v229_v59 }
  0xc3   :  { %v257_v24 = vadd.f32 %v255_v5, %v225_v1  ;;  %v258_v25 = vadd.f32 %v256_v6, %v226_v2  ;;  %v307_v26 = vadd.f32 %v305_v7, %v283_v3  ;;  %v308_v27 = vadd.f32 %v306_v8, %v284_v4 }
  0xc4   :  { %v195_v18 = vpop.permute.xlu1 %194 }
  0xc5   :  { %v211_v20 = vadd.f32 %v209_v9, %v195_v18  ;;  %v212_v21 = vadd.f32 %v210_v10, %v195_v18  ;;  %v273_v22 = vadd.f32 %v271_v11, %v195_v18  ;;  %v274_v23 = vadd.f32 %v272_v12, %v195_v18 }
  0xc7   :  { %v241_v28 = vadd.f32 %v239_v13, %v211_v20  ;;  %v242_v29 = vadd.f32 %v240_v14, %v212_v21  ;;  %v295_v30 = vadd.f32 %v293_v15, %v273_v22  ;;  %v296_v31 = vadd.f32 %v294_v17, %v274_v23 }
  0xc9   :  { %v259_v32 = vadd.f32 %v257_v24, %v241_v28  ;;  %v260_v33 = vadd.f32 %v258_v25, %v242_v29  ;;  %v309_v34 = vadd.f32 %v307_v26, %v295_v30  ;;  %v310_v35 = vadd.f32 %v308_v27, %v296_v31 }
  0xcb   :  { %261 = vst [vmem:[#allocation7] sm:$0xff] %v259_v32  ;;  %262 = vst [vmem:[#allocation7 + $0x8] sm:$0xff] %v260_v33 }
  0xcc   :  { %311 = vst [vmem:[#allocation7 + $0x10] sm:$0xff] %v309_v34  ;;  %312 = vst [vmem:[#allocation7 + $0x18] sm:$0xff] %v310_v35 }
  0xcd   :  { %405 = shalt.err (!%p402_p0)
}
  0xce   :  { %324 = dma.vmem_to_hbm [thread:$0]  %s319_s4, 512, %s564_s6, [#allocation4], %s422_s29, %s422_s29, %s423_s30  }
  0xcf   :  { %418 = dma.done.wait [#allocation4], 512  }
  0xd0   :  { %419 = vsyncadd [#allocation4], 4294966784 }
  0xd1   :  { %328 = vsyncpa [#allocation3], 1 }
  0xd2   :  { %329 = vsyncpa [#allocation6], 1 }
  0xd3   :  { %330 = vsyncpa [#allocation4], 1 }

</bundles_post_ra>
